<compile_context>
chip_gen: v5e
topology: v5e:2x2
jax: 0.10.0
libtpu: 0.0.40
codegen_flags: <defaults>
</compile_context>

<pallas_src>
import functools
import math

import jax
import jax.numpy as jnp
import numpy as np
from jax.experimental import pallas as pl
from jax.experimental.pallas import tpu as pltpu


def make_positional_table(max_seq_len: int, embed_dim: int,
                          dtype=jnp.float32) -> jnp.ndarray:
    """(1, max_seq_len, embed_dim) table matching the PyTorch __init__ loop.

    Built directly in the model dtype so the forward pass never pays a
    separate cast/copy pass over the table.
    """
    assert embed_dim % 2 == 0, "embed_dim must be even (PyTorch loop writes i+1)"
    pos = np.arange(max_seq_len, dtype=np.float64)[:, None]
    j = np.arange(embed_dim, dtype=np.float64)[None, :]
    # Both even (sin) and odd (cos) columns use exponent 2*j/d in the reference
    # module (its quirk); do NOT "fix" this to the Vaswani 2*(j//2)/d form.
    angle = pos / np.power(10000.0, 2.0 * j / embed_dim)
    table = np.where((np.arange(embed_dim) % 2 == 0)[None, :],
                     np.sin(angle), np.cos(angle))
    return jnp.asarray(table, dtype=dtype)[None, :, :]


def _round_up(v: int, m: int) -> int:
    return ((v + m - 1) // m) * m


def _choose_flat_layout(S: int, D: int, max_seq_len: int):
    """Pick a lane-dense (R, C) view shared by x (S*D elems) and pe (max*D).

    C must divide BOTH flattened lengths so the full pe table can be reshaped
    (no slice, no copy) and the same seq-tile block index addresses matching
    rows of x and pe.
    """
    flat_x, flat_pe = S * D, max_seq_len * D
    for cand in range(2048, 127, -128):          # largest 128-multiple <= 2048
        if flat_x % cand == 0 and flat_pe % cand == 0 and flat_x // cand >= 8:
            return cand, flat_x // cand, flat_pe // cand
    # TODO(synk): pad the lane dim to a multiple of 128 when S*D is not one;
    # this fallback keeps D last, which may hit masked partial stores if
    # D % 128 != 0 (only matters for large, oddly-shaped inputs).
    return D, S, max_seq_len


def _pos_embed_kernel(x_ref, pe_ref, o_ref, *, scale):
    # Tiny VPU work (1 vmul + 1 vadd per vreg), fully hidden behind the DMA.
    x = x_ref[...].astype(jnp.float32)
    p = pe_ref[...].astype(jnp.float32)          # broadcasts over the batch dim
    o_ref[...] = (x * scale + p).astype(o_ref.dtype)


def positional_embedding(x: jnp.ndarray, pe: jnp.ndarray,
                         *, vmem_budget_bytes: int = 40 * 1024 * 1024,
                         vmem_limit_bytes: int = 48 * 1024 * 1024) -> jnp.ndarray:
    """x: (B, S, D); pe: (1, max_seq_len, D).  Returns x*sqrt(D) + pe[:, :S]."""
    B, S, D = x.shape
    assert pe.ndim == 3 and pe.shape[0] == 1 and pe.shape[2] == D
    max_seq_len = pe.shape[1]
    assert max_seq_len >= S
    scale = math.sqrt(D)

    x_isz = jnp.dtype(x.dtype).itemsize
    pe_isz = jnp.dtype(pe.dtype).itemsize

    C, R, R_pe = _choose_flat_layout(S, D, max_seq_len)

    # Bytes of live (double-buffered) VMEM per row of tile, for x + pe + out,
    # when `nb` batch rows live in one block.
    def bytes_per_row(nb):
        return 2 * C * (2 * nb * x_isz + pe_isz)

    # Block the whole batch whenever even the minimal 8-row tile fits; this is
    # the common small-batch case (pe fetched once per seq tile, fewer steps).
    block_batch = B if bytes_per_row(B) * 8 <= vmem_budget_bytes else 1

    tr_budget = max(8, (vmem_budget_bytes // bytes_per_row(block_batch)) // 8 * 8)
    # Keep >=4 (>=2) seq tiles when the row count allows, so both v7x
    # TensorCores get work; near-free on single-core v5e/v6e.
    min_tiles = 4 if R >= 32 else (2 if R >= 16 else 1)
    tr_parallel = max(8, _round_up(pl.cdiv(R, min_tiles), 8))
    if R < 8:
        TR = R                                   # full-extent (legal) tiny block
    else:
        TR = min(tr_budget, tr_parallel, (R // 8) * 8)

    x3 = x.reshape(B, R, C)
    pe3 = pe.reshape(1, R_pe, C)                 # free: contiguous reshape, no slice
    if TR % 8 != 0 and R != R_pe:
        # Tiny-sequence edge case: a sub-8 full-extent block must be full for
        # BOTH arrays, so trim the table (negligible one-time copy).
        pe3 = pe3[:, :R, :]

    n_tiles = pl.cdiv(R, TR)

    if block_batch == B:
        grid = (n_tiles,)
        in_specs = [
            pl.BlockSpec((B, TR, C), lambda s: (0, s, 0)),   # x: whole batch/step
            pl.BlockSpec((1, TR, C), lambda s: (0, s, 0)),   # pe: once per seq tile
        ]
        out_spec = pl.BlockSpec((B, TR, C), lambda s: (0, s, 0))
        dims = ("parallel",)                     # megacore split on seq tiles
    else:
        # Large batch: grid batch INNERMOST so the batch-invariant pe block
        # index is unchanged on consecutive steps (not re-DMA'd); keep it
        # "arbitrary" so a megacore split stays on the seq axis (1x pe traffic).
        grid = (n_tiles, B)
        in_specs = [
            pl.BlockSpec((1, TR, C), lambda s, b: (b, s, 0)),
            pl.BlockSpec((1, TR, C), lambda s, b: (0, s, 0)),
        ]
        out_spec = pl.BlockSpec((1, TR, C), lambda s, b: (b, s, 0))
        dims = ("parallel", "arbitrary")

    out3 = pl.pallas_call(
        functools.partial(_pos_embed_kernel, scale=scale),
        out_shape=jax.ShapeDtypeStruct((B, R, C), x.dtype),
        grid=grid,
        in_specs=in_specs,
        out_specs=out_spec,
        compiler_params=pltpu.CompilerParams(
            dimension_semantics=dims,
            # Portable ceiling: fits v7x's 64 MiB/TC with headroom; v5e/v6e
            # (128 MiB) gain almost nothing beyond this for a streaming op.
            vmem_limit_bytes=vmem_limit_bytes,
        ),
    )(x3, pe3)
    return out3.reshape(B, S, D)


if __name__ == "__main__":
    # 1) Small shapes consistent with the module (natural-layout path, grid=(1,)).
    max_seq_len, embed_dim = 16, 32
    batch, seq_len = 2, 8
    pe = make_positional_table(max_seq_len, embed_dim)
    x = jax.random.normal(jax.random.PRNGKey(0), (batch, seq_len, embed_dim),
                          dtype=jnp.float32)
    ref = x * math.sqrt(embed_dim) + pe[:, :seq_len, :]
    out = jax.block_until_ready(positional_embedding(x, pe))
    assert out.shape == (batch, seq_len, embed_dim)
    assert jnp.allclose(out, ref, atol=1e-5, rtol=1e-5)

    # 2) Lane-dense flat path, whole-batch blocks, multi-tile grid (C=2048,
    #    R=64, TR=16, grid=(4,)) -- exercises the pipelined path.
    S2, D2 = 512, 256
    pe2 = make_positional_table(S2, D2)
    x2 = jax.random.normal(jax.random.PRNGKey(1), (2, S2, D2), dtype=jnp.float32)
    ref2 = x2 * math.sqrt(D2) + pe2[:, :S2, :]
    out2 = jax.block_until_ready(positional_embedding(x2, pe2))
    assert jnp.allclose(out2, ref2, atol=1e-4, rtol=1e-5)

    # 3) Force the gridded-batch fallback (batch innermost, "arbitrary") with a
    #    small VMEM budget to check that path too.
    S3, D3, B3 = 256, 128, 4
    pe3 = make_positional_table(S3, D3)
    x3 = jax.random.normal(jax.random.PRNGKey(2), (B3, S3, D3), dtype=jnp.float32)
    ref3 = x3 * math.sqrt(D3) + pe3[:, :S3, :]
    out3 = jax.block_until_ready(
        positional_embedding(x3, pe3, vmem_budget_bytes=256 * 1024))
    assert jnp.allclose(out3, ref3, atol=1e-4, rtol=1e-5)

    print("KERNEL_OK")
</pallas_src>

<mosaic_0001>
module attributes {stable_mosaic.version = 11 : i64} {
  func.func @_pos_embed_kernel(%arg0: i32, %arg1: memref<2x8x32xf32, #tpu.memory_space<vmem>>, %arg2: memref<1x8x32xf32, #tpu.memory_space<vmem>>, %arg3: memref<2x8x32xf32, #tpu.memory_space<vmem>>) attributes {dimension_semantics = [#tpu.dimension_semantics<parallel>], iteration_bounds = array<i64: 1>, scalar_prefetch = 0 : i64, scratch_operands = 0 : i64, tpu.core_type = #tpu.core_type<tc>, window_params = [{transform_indices = @transform_0, window_bounds = array<i64: 2, 8, 32>}, {transform_indices = @transform_1, window_bounds = array<i64: 1, 8, 32>}, {transform_indices = @transform_2, window_bounds = array<i64: 2, 8, 32>}]} {
    %c0 = arith.constant 0 : index
    %c0_0 = arith.constant 0 : index
    %c0_1 = arith.constant 0 : index
    %0 = vector.load %arg1[%c0, %c0_0, %c0_1] : memref<2x8x32xf32, #tpu.memory_space<vmem>>, vector<2x8x32xf32>
    %c0_2 = arith.constant 0 : index
    %c0_3 = arith.constant 0 : index
    %c0_4 = arith.constant 0 : index
    %1 = vector.load %arg2[%c0_2, %c0_3, %c0_4] : memref<1x8x32xf32, #tpu.memory_space<vmem>>, vector<1x8x32xf32>
    %cst = arith.constant 5.65685415 : f32
    %2 = vector.broadcast %cst : f32 to vector<2x8x32xf32>
    %3 = arith.mulf %0, %2 : vector<2x8x32xf32>
    %4 = vector.broadcast %1 : vector<1x8x32xf32> to vector<2x8x32xf32>
    %5 = arith.addf %3, %4 : vector<2x8x32xf32>
    %c0_5 = arith.constant 0 : index
    %c0_6 = arith.constant 0 : index
    %c0_7 = arith.constant 0 : index
    %6 = vector.load %arg3[%c0_5, %c0_6, %c0_7] : memref<2x8x32xf32, #tpu.memory_space<vmem>>, vector<2x8x32xf32>
    tpu.vector_store %arg3[%c0_5, %c0_6, %c0_7], %5 {strides = array<i32>} : memref<2x8x32xf32, #tpu.memory_space<vmem>>, vector<2x8x32xf32>,
    return
  }
  func.func @transform_0(%arg0: i32) -> (i32, i32, i32) {
    %c0_i32 = arith.constant 0 : i32
    %c0_i32_0 = arith.constant 0 : i32
    %c0_i32_1 = arith.constant 0 : i32
    return %c0_i32, %arg0, %c0_i32_0 : i32, i32, i32
  }
  func.func @transform_1(%arg0: i32) -> (i32, i32, i32) {
    %c0_i32 = arith.constant 0 : i32
    %c0_i32_0 = arith.constant 0 : i32
    %c0_i32_1 = arith.constant 0 : i32
    return %c0_i32, %arg0, %c0_i32_0 : i32, i32, i32
  }
  func.func @transform_2(%arg0: i32) -> (i32, i32, i32) {
    %c0_i32 = arith.constant 0 : i32
    %c0_i32_0 = arith.constant 0 : i32
    %c0_i32_1 = arith.constant 0 : i32
    return %c0_i32, %arg0, %c0_i32_0 : i32, i32, i32
  }
}

</mosaic_0001>

<bundles_post_ra>
// kernel: tpu_custom_call.1
= control target key start
LH: loop header
LB: loop body
LE: loop exit
PB: predicated region body
PF: predicated region fallthrough
CT: control target
= control target key end

     0   :  { %7 = vsyncpa [#allocation3], 0  ;;  %s190_s0 = inlined_call_operand.hbm [shape: f32[2,8,32], index: 0, kind: input, shape index: {}]   ;;  %s191_s1 = inlined_call_operand.hbm [shape: f32[1,16,32], index: 1, kind: input, shape index: {}]   ;;  %s192_s2 = inlined_call_operand.hbm [shape: f32[2,8,32], index: 2, kind: output, shape index: {}]  }
   0x1   :  { %8 = vsyncpa [#allocation6], 0 }
   0x2   :  { %9 = vsyncpa [#allocation4], 0  ;;  %s14_s11 = sshll.u32 %s190_s0, 4  ;;  %s155_s12 = smov [#allocation2]   ;;  %s15_s11 = int_to_ptr.hbm [resolvable:$true] %s14_s11 }
   0x3   :  { %s16_s13 = sshll.u32 %s155_s12, 4  ;;  %s28_s16 = sshll.u32 %s191_s1, 4  ;;  %s17_s13 = int_to_ptr.vmem [resolvable:$true] %s16_s13  ;;  %s29_s16 = int_to_ptr.hbm [resolvable:$true] %s28_s16 }
   0x4   :  { %s156_s17 = smov 128   ;;  %s157_s18 = smov 8  }
   0x5   :  { %22 = dma.hbm_to_vmem [thread:$0]  %s15_s11, 256, %s17_s13, [#allocation3], %s156_s17, %s156_s17, %s157_s18  }
   0x6   :  { %s158_s19 = smov [#allocation5]  }
   0x7   :  { %s30_s20 = sshll.u32 %s158_s19, 4  ;;  %s31_s20 = int_to_ptr.vmem [resolvable:$true] %s30_s20 }
   0x8   :  { %33 = dma.hbm_to_vmem [thread:$0]  %s29_s16, 128, %s31_s20, [#allocation6]  }
   0x9   :  { %149 = dma.done.wait [#allocation3], 256  }
   0xa   :  { %150 = vsyncadd [#allocation3], 4294967040 }
   0xb   :  { %151 = dma.done.wait [#allocation6], 128  }
   0xc   :  { %152 = vsyncadd [#allocation6], 4294967168  ;;  %v42_v0 = vld [vmem:[#allocation2] sm:$0xff]  ;;  %v44_v1 = vld [vmem:[#allocation5] sm:$0xff]  ;;  %s159_s0 = smov [#allocation7]   ;;  %s58_s23 = sshll.u32 %s192_s2, 4  ;;  %s59_s23 = int_to_ptr.hbm [resolvable:$true] %s58_s23 }
   0xd   :  { %v43_v2 = vld [vmem:[#allocation2 + $0x8] sm:$0xff]  ;;  %v45_v3 = vmul.f32 5.656854, %v42_v0  ;;  %s56_s1 = sshll.u32 %s159_s0, 4  ;;  %vm49_vm0 = vcmask 261120   ;;  %s57_s1 = int_to_ptr.vmem [resolvable:$true] %s56_s1 }
   0xe   :  { %v46_v4 = vmul.f32 5.656854, %v43_v2 }
   0xf   :  { %v47_v5 = vadd.f32 %v45_v3, %v44_v1 }
  0x10   :  { %v48_v6 = vadd.f32 %v46_v4, %v44_v1 }
  0x11   :  { %50 = vst.msk [vmem:[#allocation7] sm:$0xff] %vm49_vm0, %v47_v5 }
  0x12   :  { %51 = vst.msk [vmem:[#allocation7 + $0x8] sm:$0xff] %vm49_vm0, %v48_v6 }
  0x13   :  { %64 = dma.vmem_to_hbm [thread:$0]  %s57_s1, 256, %s59_s23, [#allocation4], %s156_s17, %s156_s17, %s157_s18  }
  0x14   :  { %153 = dma.done.wait [#allocation4], 256  }
  0x15   :  { %154 = vsyncadd [#allocation4], 4294967040 }
  0x16   :  { %69 = vsyncpa [#allocation3], 1 }
  0x17   :  { %70 = vsyncpa [#allocation6], 1 }
  0x18   :  { %71 = vsyncpa [#allocation4], 1 }

</bundles_post_ra>
